<compile_context>
chip_gen: v5e
topology: v5e:2x2
jax: 0.10.0
libtpu: 0.0.40
codegen_flags: <defaults>
</compile_context>

<pallas_src>
import math

import jax
import jax.numpy as jnp
from jax.experimental import pallas as pl
from jax.experimental.pallas import tpu as pltpu

KERNEL_SIZE = 5
SIGMA = 0.5
PAD = KERNEL_SIZE // 2   # = 2
LANE = 128               # TPU lane width

_SMALL_BYPASS_BYTES = 256 << 10          # below this, pure-JAX fused path
_TARGET_BLOCK_BYTES = {5: 4 << 20, 6: 8 << 20, 7: 3 << 20}
_VMEM_LIMIT_BYTES = {5: 64 << 20, 6: 96 << 20, 7: 48 << 20}


def _gaussian_taps():
    # Matches torch: t = arange(-kernel_size//2 + 1.0, kernel_size//2 + 1.0)
    #              = [-2, -1, 0, 1, 2]
    ts = range(-(KERNEL_SIZE // 2), KERNEL_SIZE // 2 + 1)
    ws = [math.exp(-0.5 * (t / SIGMA) ** 2) for t in ts]
    s = sum(ws)
    return [w / s for w in ws]           # plain Python floats (trace-time consts)


def _tpu_generation():
    """Best-effort TPU generation (5/6/7) from device_kind; None if unknown."""
    try:
        kind = (jax.devices()[0].device_kind or "").lower()
    except Exception:
        return None
    for g in (7, 6, 5):
        if f"v{g}" in kind:
            return g
    return None


def _make_kernel(lp):
    taps = _gaussian_taps()               # [w2, w1, w0, w1, w2] (symmetric)
    w2, w1, w0 = taps[0], taps[1], taps[2]

    def kernel(x_ref, o_ref):
        # x_ref / o_ref: (TB, lp) blocks; lp is a multiple of 128 (lane-dense).
        x = x_ref[...]                    # single load of the tile (f32)

        # Symmetric circular 5-tap conv along lanes: 4 XLU rolls (free slot
        # relative to the VPU), 3 muls + 4 adds per vreg.  Taps are
        # compile-time Python floats, so no SMEM operands / scalar loads.
        acc = (w0 * x
               + w1 * (pltpu.roll(x, shift=1, axis=1)
                       + pltpu.roll(x, shift=lp - 1, axis=1))
               + w2 * (pltpu.roll(x, shift=2, axis=1)
                       + pltpu.roll(x, shift=lp - 2, axis=1)))
        o_ref[...] = acc.astype(o_ref.dtype)

        # Targeted boundary fixes: only the 4 wrap-affected columns differ
        # from the zero-padded F.conv1d result.  Overwrite them with the exact
        # values, computed from (TB, 1) slices of the already-loaded tile.
        c0, c1 = x[:, 0:1], x[:, 1:2]
        c2, c3 = x[:, 2:3], x[:, 3:4]
        m1, m2 = x[:, lp - 1:lp], x[:, lp - 2:lp - 1]
        m3, m4 = x[:, lp - 3:lp - 2], x[:, lp - 4:lp - 3]
        o_ref[:, 0:1] = (w0 * c0 + w1 * c1 + w2 * c2).astype(o_ref.dtype)
        o_ref[:, 1:2] = (w1 * c0 + w0 * c1 + w1 * c2 + w2 * c3).astype(o_ref.dtype)
        o_ref[:, lp - 2:lp - 1] = (
            w2 * m4 + w1 * m3 + w0 * m2 + w1 * m1).astype(o_ref.dtype)
        o_ref[:, lp - 1:lp] = (w2 * m3 + w1 * m2 + w0 * m1).astype(o_ref.dtype)

    return kernel


def _batch_tile(batch, lp, block_batch, gen):
    """Batch tile: multiple of 8, sized per generation, <= batch."""
    if block_batch is not None:
        return block_batch
    if batch <= 8:
        return batch                      # single full-batch block
    target = _TARGET_BLOCK_BYTES.get(gen, 4 << 20)
    tb = max(8, (target // (lp * 4)) // 8 * 8)
    if gen == 7 and batch >= 16:
        # v7x: make sure there are at least 2 batch blocks so both
        # TensorCores get work under CORE_PARALLEL.
        half = (batch // 2) // 8 * 8
        if half >= 8:
            tb = min(tb, half)
    return batch if tb >= batch else tb


def gaussian_blur_conv(x, *, block_batch=None, force_pallas=False):
    """5-tap Gaussian blur (sigma=0.5, zero padding) along dim 1 of (B, L)."""
    b, l = x.shape

    # Tiny-shape bypass: fixed pallas_call / grid-step overhead dwarfs the
    # blur itself; let XLA fuse the elementwise chain instead.
    if not force_pallas and b * l * x.dtype.itemsize < _SMALL_BYPASS_BYTES:
        return _blur_ref(x)

    lp = ((l + LANE - 1) // LANE) * LANE
    # Fallback only for non-lane-aligned L: zero-pad L up to a multiple of 128
    # (realistic sizes are already aligned and take the pad-free path).
    xp = x if lp == l else jnp.pad(x, ((0, 0), (0, lp - l)))

    gen = _tpu_generation()
    tb = _batch_tile(b, lp, block_batch, gen)
    grid = (pl.cdiv(b, tb),)

    # Only CORE_PARALLEL actually shards a grid axis across v7x's 2 TCs;
    # elsewhere "parallel" is kept (near-zero codegen impact but harmless).
    if gen == 7 and grid[0] >= 2:
        dims = (pltpu.CORE_PARALLEL,)
    else:
        dims = ("parallel",)

    out = pl.pallas_call(
        _make_kernel(lp),
        out_shape=jax.ShapeDtypeStruct((b, lp), x.dtype),
        grid=grid,
        in_specs=[pl.BlockSpec((tb, lp), lambda i: (i, 0))],
        out_specs=pl.BlockSpec((tb, lp), lambda i: (i, 0)),
        compiler_params=pltpu.CompilerParams(
            dimension_semantics=dims,
            vmem_limit_bytes=_VMEM_LIMIT_BYTES.get(gen, 64 << 20)),
        cost_estimate=pl.CostEstimate(
            flops=9 * b * lp,
            transcendentals=0,
            bytes_accessed=2 * b * lp * 4),
    )(xp)
    return out if lp == l else out[:, :l]


def _blur_ref(x):
    # Pure-JAX reference (same math as F.conv1d with the Gaussian taps).
    # Also used as the fused small-shape bypass.
    w = _gaussian_taps()
    xpad = jnp.pad(x, ((0, 0), (PAD, PAD)))
    l = x.shape[1]
    out = jnp.zeros_like(x)
    for k in range(KERNEL_SIZE):
        out = out + w[k] * xpad[:, k:k + l]
    return out


if __name__ == "__main__":
    key = jax.random.PRNGKey(0)
    k1, k2, k3 = jax.random.split(key, 3)

    # Case 1: the small (batch, seq_len) shape the module's forward implies;
    # takes the fused pure-JAX bypass (pallas overhead would dominate here).
    x1 = jax.random.normal(k1, (2, 16), dtype=jnp.float32)
    out1 = jax.block_until_ready(gaussian_blur_conv(x1))
    assert out1.shape == x1.shape
    assert jnp.allclose(out1, _blur_ref(x1), atol=1e-5, rtol=1e-5)

    # Case 2: lane-aligned seq_len with several batch blocks -> pad-free
    # Pallas path, grid > 1, pipelined (core-parallel on v7x).
    x2 = jax.random.normal(k2, (32, 256), dtype=jnp.float32)
    out2 = jax.block_until_ready(
        gaussian_blur_conv(x2, block_batch=8, force_pallas=True))
    assert out2.shape == x2.shape
    assert jnp.allclose(out2, _blur_ref(x2), atol=1e-5, rtol=1e-5)

    # Case 3: non-lane-aligned seq_len forced through the Pallas path
    # (exercises the pad-to-128 fallback + boundary fixes near l-1/l-2).
    x3 = jax.random.normal(k3, (16, 200), dtype=jnp.float32)
    out3 = jax.block_until_ready(gaussian_blur_conv(x3, force_pallas=True))
    assert out3.shape == x3.shape
    assert jnp.allclose(out3, _blur_ref(x3), atol=1e-5, rtol=1e-5)

    print("KERNEL_OK")
</pallas_src>

<mosaic_0001>
module attributes {stable_mosaic.version = 11 : i64} {
  func.func @kernel(%arg0: i32, %arg1: memref<8x256xf32, #tpu.memory_space<vmem>>, %arg2: memref<8x256xf32, #tpu.memory_space<vmem>>) attributes {dimension_semantics = [#tpu.dimension_semantics<parallel>], iteration_bounds = array<i64: 4>, scalar_prefetch = 0 : i64, scratch_operands = 0 : i64, tpu.core_type = #tpu.core_type<tc>, window_params = [{transform_indices = @transform_0, window_bounds = array<i64: 8, 256>}, {transform_indices = @transform_1, window_bounds = array<i64: 8, 256>}]} {
    %c0 = arith.constant 0 : index
    %c0_0 = arith.constant 0 : index
    %0 = vector.load %arg1[%c0, %c0_0] : memref<8x256xf32, #tpu.memory_space<vmem>>, vector<8x256xf32>
    %cst = arith.constant 0.786570727 : f32
    %1 = vector.broadcast %cst : f32 to vector<8x256xf32>
    %2 = arith.mulf %1, %0 : vector<8x256xf32>
    %c1_i32 = arith.constant 1 : i32
    %3 = tpu.dynamic_rotate %0 by %c1_i32 dim 1 : vector<8x256xf32>, i32 -> vector<8x256xf32>
    %c255_i32 = arith.constant 255 : i32
    %4 = tpu.dynamic_rotate %0 by %c255_i32 dim 1 : vector<8x256xf32>, i32 -> vector<8x256xf32>
    %5 = arith.addf %3, %4 : vector<8x256xf32>
    %cst_1 = arith.constant 0.106450774 : f32
    %6 = vector.broadcast %cst_1 : f32 to vector<8x256xf32>
    %7 = arith.mulf %6, %5 : vector<8x256xf32>
    %8 = arith.addf %2, %7 : vector<8x256xf32>
    %c2_i32 = arith.constant 2 : i32
    %9 = tpu.dynamic_rotate %0 by %c2_i32 dim 1 : vector<8x256xf32>, i32 -> vector<8x256xf32>
    %c254_i32 = arith.constant 254 : i32
    %10 = tpu.dynamic_rotate %0 by %c254_i32 dim 1 : vector<8x256xf32>, i32 -> vector<8x256xf32>
    %11 = arith.addf %9, %10 : vector<8x256xf32>
    %cst_2 = arith.constant 2.63865077E-4 : f32
    %12 = vector.broadcast %cst_2 : f32 to vector<8x256xf32>
    %13 = arith.mulf %12, %11 : vector<8x256xf32>
    %14 = arith.addf %8, %13 : vector<8x256xf32>
    %c0_3 = arith.constant 0 : index
    %c0_4 = arith.constant 0 : index
    %15 = vector.load %arg2[%c0_3, %c0_4] : memref<8x256xf32, #tpu.memory_space<vmem>>, vector<8x256xf32>
    tpu.vector_store %arg2[%c0_3, %c0_4], %14 {strides = array<i32>} : memref<8x256xf32, #tpu.memory_space<vmem>>, vector<8x256xf32>,
    %16 = vector.extract_strided_slice %0 {offsets = [0, 0], sizes = [8, 1], strides = [1, 1]} : vector<8x256xf32> to vector<8x1xf32>
    %17 = vector.extract_strided_slice %0 {offsets = [0, 1], sizes = [8, 1], strides = [1, 1]} : vector<8x256xf32> to vector<8x1xf32>
    %18 = vector.extract_strided_slice %0 {offsets = [0, 2], sizes = [8, 1], strides = [1, 1]} : vector<8x256xf32> to vector<8x1xf32>
    %19 = vector.extract_strided_slice %0 {offsets = [0, 3], sizes = [8, 1], strides = [1, 1]} : vector<8x256xf32> to vector<8x1xf32>
    %20 = vector.extract_strided_slice %0 {offsets = [0, 255], sizes = [8, 1], strides = [1, 1]} : vector<8x256xf32> to vector<8x1xf32>
    %21 = vector.extract_strided_slice %0 {offsets = [0, 254], sizes = [8, 1], strides = [1, 1]} : vector<8x256xf32> to vector<8x1xf32>
    %22 = vector.extract_strided_slice %0 {offsets = [0, 253], sizes = [8, 1], strides = [1, 1]} : vector<8x256xf32> to vector<8x1xf32>
    %23 = vector.extract_strided_slice %0 {offsets = [0, 252], sizes = [8, 1], strides = [1, 1]} : vector<8x256xf32> to vector<8x1xf32>
    %cst_5 = arith.constant 0.786570727 : f32
    %24 = vector.broadcast %cst_5 : f32 to vector<8x1xf32>
    %25 = arith.mulf %24, %16 : vector<8x1xf32>
    %cst_6 = arith.constant 0.106450774 : f32
    %26 = vector.broadcast %cst_6 : f32 to vector<8x1xf32>
    %27 = arith.mulf %26, %17 : vector<8x1xf32>
    %28 = arith.addf %25, %27 : vector<8x1xf32>
    %cst_7 = arith.constant 2.63865077E-4 : f32
    %29 = vector.broadcast %cst_7 : f32 to vector<8x1xf32>
    %30 = arith.mulf %29, %18 : vector<8x1xf32>
    %31 = arith.addf %28, %30 : vector<8x1xf32>
    %c0_8 = arith.constant 0 : index
    %c0_9 = arith.constant 0 : index
    %32 = vector.load %arg2[%c0_8, %c0_9] : memref<8x256xf32, #tpu.memory_space<vmem>>, vector<8x1xf32>
    tpu.vector_store %arg2[%c0_8, %c0_9], %31 {strides = array<i32>} : memref<8x256xf32, #tpu.memory_space<vmem>>, vector<8x1xf32>,
    %cst_10 = arith.constant 0.106450774 : f32
    %33 = vector.broadcast %cst_10 : f32 to vector<8x1xf32>
    %34 = arith.mulf %33, %16 : vector<8x1xf32>
    %cst_11 = arith.constant 0.786570727 : f32
    %35 = vector.broadcast %cst_11 : f32 to vector<8x1xf32>
    %36 = arith.mulf %35, %17 : vector<8x1xf32>
    %37 = arith.addf %34, %36 : vector<8x1xf32>
    %cst_12 = arith.constant 0.106450774 : f32
    %38 = vector.broadcast %cst_12 : f32 to vector<8x1xf32>
    %39 = arith.mulf %38, %18 : vector<8x1xf32>
    %40 = arith.addf %37, %39 : vector<8x1xf32>
    %cst_13 = arith.constant 2.63865077E-4 : f32
    %41 = vector.broadcast %cst_13 : f32 to vector<8x1xf32>
    %42 = arith.mulf %41, %19 : vector<8x1xf32>
    %43 = arith.addf %40, %42 : vector<8x1xf32>
    %c0_14 = arith.constant 0 : index
    %c1 = arith.constant 1 : index
    %44 = vector.load %arg2[%c0_14, %c1] : memref<8x256xf32, #tpu.memory_space<vmem>>, vector<8x1xf32>
    tpu.vector_store %arg2[%c0_14, %c1], %43 {strides = array<i32>} : memref<8x256xf32, #tpu.memory_space<vmem>>, vector<8x1xf32>,
    %cst_15 = arith.constant 2.63865077E-4 : f32
    %45 = vector.broadcast %cst_15 : f32 to vector<8x1xf32>
    %46 = arith.mulf %45, %23 : vector<8x1xf32>
    %cst_16 = arith.constant 0.106450774 : f32
    %47 = vector.broadcast %cst_16 : f32 to vector<8x1xf32>
    %48 = arith.mulf %47, %22 : vector<8x1xf32>
    %49 = arith.addf %46, %48 : vector<8x1xf32>
    %cst_17 = arith.constant 0.786570727 : f32
    %50 = vector.broadcast %cst_17 : f32 to vector<8x1xf32>
    %51 = arith.mulf %50, %21 : vector<8x1xf32>
    %52 = arith.addf %49, %51 : vector<8x1xf32>
    %cst_18 = arith.constant 0.106450774 : f32
    %53 = vector.broadcast %cst_18 : f32 to vector<8x1xf32>
    %54 = arith.mulf %53, %20 : vector<8x1xf32>
    %55 = arith.addf %52, %54 : vector<8x1xf32>
    %c0_19 = arith.constant 0 : index
    %c254 = arith.constant 254 : index
    %56 = vector.load %arg2[%c0_19, %c254] : memref<8x256xf32, #tpu.memory_space<vmem>>, vector<8x1xf32>
    tpu.vector_store %arg2[%c0_19, %c254], %55 {strides = array<i32>} : memref<8x256xf32, #tpu.memory_space<vmem>>, vector<8x1xf32>,
    %cst_20 = arith.constant 2.63865077E-4 : f32
    %57 = vector.broadcast %cst_20 : f32 to vector<8x1xf32>
    %58 = arith.mulf %57, %22 : vector<8x1xf32>
    %cst_21 = arith.constant 0.106450774 : f32
    %59 = vector.broadcast %cst_21 : f32 to vector<8x1xf32>
    %60 = arith.mulf %59, %21 : vector<8x1xf32>
    %61 = arith.addf %58, %60 : vector<8x1xf32>
    %cst_22 = arith.constant 0.786570727 : f32
    %62 = vector.broadcast %cst_22 : f32 to vector<8x1xf32>
    %63 = arith.mulf %62, %20 : vector<8x1xf32>
    %64 = arith.addf %61, %63 : vector<8x1xf32>
    %c0_23 = arith.constant 0 : index
    %c255 = arith.constant 255 : index
    %65 = vector.load %arg2[%c0_23, %c255] : memref<8x256xf32, #tpu.memory_space<vmem>>, vector<8x1xf32>
    tpu.vector_store %arg2[%c0_23, %c255], %64 {strides = array<i32>} : memref<8x256xf32, #tpu.memory_space<vmem>>, vector<8x1xf32>,
    return
  }
  func.func @transform_0(%arg0: i32) -> (i32, i32) {
    %c0_i32 = arith.constant 0 : i32
    %c0_i32_0 = arith.constant 0 : i32
    return %arg0, %c0_i32 : i32, i32
  }
  func.func @transform_1(%arg0: i32) -> (i32, i32) {
    %c0_i32 = arith.constant 0 : i32
    %c0_i32_0 = arith.constant 0 : i32
    return %arg0, %c0_i32 : i32, i32
  }
}

</mosaic_0001>

<bundles_post_ra>
// kernel: tpu_custom_call.1
= control target key start
LH: loop header
LB: loop body
LE: loop exit
PB: predicated region body
PF: predicated region fallthrough
CT: control target
= control target key end

     0   :  { %6 = vsyncpa [#allocation3], 0  ;;  %s649_s0 = inlined_call_operand.hbm [shape: f32[32,256], index: 0, kind: input, shape index: {}]   ;;  %s650_s1 = inlined_call_operand.hbm [shape: f32[32,256], index: 1, kind: output, shape index: {}]  }
   0x1   :  { %8 = vsyncpa [#allocation3 + $0x1], 0 }
   0x2   :  { %9 = vsyncpa [#allocation4], 0 }
   0x3   :  { %11 = vsyncpa [#allocation4 + $0x1], 0  ;;  %s511_s6 = smov 0   ;;  %s513_s7 = smov 0  }
   0x4   :  { %s515_s8 = smov 0   ;;  %s517_s9 = smov 0  }
   0x5 LB: > { %s532_s10 = sadd.s32 4294967295, %s494_s9   ;;  %s331_s11 = sadd.s32 4294967294, %s494_s9   ;;  %s494_s9 = sphi %s517_s9, %s659_s9   ;;  %s490_s8 = sphi %s515_s8, %s658_s8   ;;  %s486_s7 = sphi %s513_s7, %s657_s7   ;;  %s482_s6 = sphi %s511_s6, %s656_s6  }
   0x6   : > { %s536_s12 = sadd.s32 1, %s494_s9   ;;  %s24_s13 = sadd.s32 1, %s490_s8 }
   0x7   : > { %s21_s14 = ssub.s32 %s494_s9, %s536_s12  ;;  %p31_p0 = scmp.ne.s32.totalorder %s490_s8, %s486_s7 }
   0x8   : > { %p22_p1 = scmp.eq.s32.totalorder %s21_s14, 0  ;;  %p32_p2 = scmp.eq.s32.totalorder %s494_s9, 0 }
   0x9   : > { %p37_p3 = scmp.ne.s32.totalorder %s486_s7, %s482_s6  ;;  %p38_p4 = scmp.eq.s32.totalorder %s532_s10, 0 }
   0xa   : > { %s548_s15 = scalar_select %p22_p1, %s490_s8, %s24_s13  }
   0xb   : > { %p550_p5 = por %p32_p2, %p31_p0  ;;  %p554_p6 = por %p38_p4, %p37_p3 }
   0xc   : > { %p61_p7 = scmp.eq.s32.totalorder %s532_s10, 3  ;;  %p67_p8 = scmp.eq.s32.totalorder %s331_s11, 3 }
   0xd   : > { %p359_p9 = scmp.lt.s32.totalorder %s494_s9, 4  ;;  %s87_s20 = sand.u32 1, %s490_s8  }
   0xe   : > { %p560_p10 = por %p61_p7, %p31_p0  ;;  %p564_p11 = por %p67_p8, %p37_p3 }
   0xf   : > { %s345_s21 = sshll.u32 %s494_s9, 4  ;;  %s334_s22 = sshll.u32 %s87_s20, 4 }
  0x10   : > { %s96_s25 = scalar_lea.hbm %s649_s0, %s345_s21  ;;  %s91_s27 = scalar_lea.vmem [#allocation2], %s334_s22 }
  0x11   : > { %s98_s26 = sshll.u32 %s96_s25, 4  ;;  %s100_s28 = sshll.u32 %s91_s27, 4  ;;  %s99_s26 = int_to_ptr.hbm [resolvable:$true] %s98_s26  ;;  %s101_s28 = int_to_ptr.vmem [resolvable:$true] %s100_s28 }
  0x12   : > { %p575_p12 = pnand %p359_p9, %p550_p5  ;;  %p337_p13 = scmp.ge.s32.totalorder %s494_s9, 1 }
  0x13   : > { %p105_p0 = scmp.lt.s32.totalorder %s494_s9, 5  ;;  %s88_s30 = scalar_lea.sflag [#allocation3], %s87_s20 }
  0x14   : > { %s398_s2 = sshra.s32 %s99_s26, 4  ;;  %p402_p2 = pneg %p575_p12  ;;  %s399_s2 = int_to_ptr.hbm [resolvable:$true] %s398_s2 }
  0x15   : > { %s400_s3 = scalar_lea.hbm %s399_s2, 16  ;;  %s405_s11 = scalar_lea.hbm %s649_s0, 64 }
  0x16   : > { %p401_p1 = scmp.ne.s32.totalorder %s399_s2, %s400_s3  ;;  %p406_p5 = scmp.lt.s32.totalorder %s399_s2, %s649_s0 }
  0x17   : > { %p407_p7 = scmp.lt.s32.totalorder %s405_s11, %s400_s3 }
  0x18   : > { %p403_p3 = pnand %p402_p2, %p401_p1 }
  0x19   : > { %p408_p8 = por %p407_p7, %p406_p5 }
  0x1a   : > { %p404_p4 = pneg %p403_p3 }
  0x1c   : > { %p409_p9 = pnand %p408_p8, %p404_p4 }
  0x1e   : > { %412 = shalt.err (!%p409_p9)
}
  0x1f   : > { %354 = dma.hbm_to_vmem [thread:$0]  (!%p575_p12), %s99_s26, 256, %s101_s28, %s88_s30  }
  0x20   : > { %p106_p1 = pnand %p337_p13, %p105_p0 }
  0x21   : > { %s596_s16 = sand.u32 (!%p106_p1), 1, %s486_s7  }
  0x22   : > { %109 = sbr.rel (%p106_p1) target bundleno = 283 (0x11b), region = 24  ;;  %s338_s20 = sshll.u32 (!%p106_p1), %s596_s16, 4 }
  0x23   : > { %s112_s21 = scalar_lea.sflag (!%p106_p1), [#allocation3], %s596_s16  ;;  %s115_s22 = scalar_lea.vmem (!%p106_p1), [#allocation2], %s338_s20 }
  0x27   : > { %473 = dma.done.wait (%p554_p6), %s112_s21, 256  }
  0x28   : > { %475 = vsyncadd (%p554_p6), %s112_s21, 4294967040  ;;  %v136_v0 = vld [vmem:[%s115_s22 + $0x8] sm:$0xff]  ;;  %s496_s23 = smov 127   ;;  %s497_s24 = smov 126   ;;  %v135_v3 = vld [vmem:[%s115_s22] sm:$0xff]  ;;  %v143_v19 = vlaneseq  ;;  %vm195_vm4 = vcmask 7168  }
  0x29   : > { %v217_v1 = vmul.f32 0.106450774, %v136_v0  ;;  %v606_v2 = vmul.f32 0.7865707, %v136_v0  ;;  %s498_s25 = smov 125   ;;  %s499_s17 = smov 1  }
  0x2a   : > { %v609_v4 = vmul.f32 0.7865707, %v135_v3  ;;  %v183_v5 = vmul.f32 0.106450774, %v135_v3  ;;  %v189_v6 = vmul.f32 0.00026386508, %v135_v3 }
  0x2b   : > { %219 = vrot.lane.b32.xlu0 %v217_v1, %s496_s23  ;;  %224 = vrot.lane.b32.xlu1 %v606_v2, %s497_s24  ;;  %s500_s26 = smov 2   ;;  %v216_v7 = vmul.f32 0.00026386508, %v136_v0  ;;  %v144_v22 = vand.u32 127, %v143_v19  ;;  %s134_s27 = scalar_lea.vmem [#allocation5], %s338_s20  ;;  %vm214_vm5 = vcmask 15368  }
  0x2c   : > { %228 = vrot.lane.b32.xlu2 %v217_v1, %s498_s25  ;;  %s346_s28 = sshll.u32 %s532_s10, 4  ;;  %s258_s3 = sshll.u32 %s134_s27, 4  ;;  %vm236_vm6 = vcmask 1040368   ;;  %vm242_vm7 = vcmask 1048568   ;;  %s259_s3 = int_to_ptr.vmem [resolvable:$true] %s258_s3 }
  0x2d   : > { %vm145_vm0 = vcmp.lt.s32.totalorder %v144_v22, 1  ;;  %vm152_vm1 = vcmp.lt.s32.totalorder %v144_v22, 127  ;;  %vm165_vm2 = vcmp.lt.s32.totalorder %v144_v22, 2  ;;  %vm172_vm3 = vcmp.lt.s32.totalorder %v144_v22, 126  ;;  %s256_s2 = scalar_lea.hbm %s650_s1, %s346_s28  ;;  %s245_s5 = scalar_lea.sflag [#allocation4], %s596_s16 }
  0x2e   : > { %s260_s4 = sshll.u32 %s256_s2, 4  ;;  %s448_s20 = scalar_lea.hbm %s650_s1, 64  ;;  %s261_s4 = int_to_ptr.hbm [resolvable:$true] %s260_s4 }
  0x2f   : > { %s442_s11 = sshra.s32 %s261_s4, 4  ;;  %s443_s11 = int_to_ptr.hbm [resolvable:$true] %s442_s11 }
  0x30   : > { %s444_s13 = scalar_lea.hbm %s443_s11, 16  ;;  %p449_p0 = scmp.lt.s32.totalorder %s443_s11, %s650_s1 }
  0x31   : > { %p445_p6 = scmp.ne.s32.totalorder %s443_s11, %s444_s13  ;;  %p450_p2 = scmp.lt.s32.totalorder %s448_s20, %s444_s13 }
  0x33   : > { %198 = vrot.lane.b32.xlu0 %v609_v4, %s496_s23  ;;  %202 = vrot.lane.b32.xlu1 %v183_v5, %s497_s24  ;;  %p446_p12 = pnand %p445_p6, %p560_p10  ;;  %p451_p3 = por %p450_p2, %p449_p0 }
  0x34   : > { %206 = vrot.lane.b32.xlu2 %v189_v6, %s498_s25 }
  0x35   : > { %p447_p13 = pneg %p446_p12 }
  0x37   : > { %p452_p4 = pnand %p451_p3, %p447_p13 }
  0x3b   : > { %141 = vrot.lane.b32.xlu1 %v136_v0, %s499_s17  ;;  %139 = vrot.lane.b32.xlu0 %v135_v3, %s499_s17 }
  0x3c   : > { %148 = vrot.lane.b32.xlu2 %v135_v3, %s496_s23 }
  0x43   : > { %161 = vrot.lane.b32.xlu1 %v135_v3, %s500_s26  ;;  %150 = vrot.lane.b32.xlu0 %v136_v0, %s496_s23 }
  0x44   : > { %163 = vrot.lane.b32.xlu2 %v136_v0, %s500_s26 }
  0x4b   : > { %170 = vrot.lane.b32.xlu1 %v136_v0, %s497_s24  ;;  %168 = vrot.lane.b32.xlu0 %v135_v3, %s497_s24 }
  0x4c   : > { %185 = vrot.lane.b32.xlu2 %v183_v5, %s496_s23 }
  0x53   : > { %191 = vrot.lane.b32.xlu0 %v189_v6, %s497_s24 }
  0x86   : > { %v229_v11 = vpop.permute.xlu2 %228 }
  0x8e   : > { %v207_v17 = vpop.permute.xlu2 %206 }
  0x96   : > { %v149_v24 = vpop.permute.xlu2 %148 }
  0x9d   : > { %v220_v8 = vpop.permute.xlu0 %219  ;;  %v225_v9 = vpop.permute.xlu1 %224 }
  0x9e   : > { %v222_v10 = vadd.f32 %v220_v8, %v216_v7  ;;  %v164_v33 = vpop.permute.xlu2 %163 }
  0xa0   : > { %v227_v12 = vadd.f32 %v225_v9, %v222_v10 }
  0xa2   : > { %v231_v13 = vadd.f32 %v229_v11, %v227_v12  ;;  %239 = vrot.lane.b32.xlu0 %v227_v12, %s500_s26 }
  0xa4   : > { %233 = vrot.lane.b32.xlu1 %v231_v13, %s500_s26 }
  0xa5   : > { %v199_v14 = vpop.permute.xlu0 %198  ;;  %v203_v15 = vpop.permute.xlu1 %202 }
  0xa6   : > { %v201_v16 = vadd.f32 %v199_v14, %v183_v5  ;;  %v186_v50 = vpop.permute.xlu2 %185 }
  0xa7   : > { %v188_v51 = vadd.f32 %v186_v50, %v609_v4 }
  0xa8   : > { %v205_v18 = vadd.f32 %v203_v15, %v201_v16 }
  0xaa   : > { %v209_v20 = vadd.f32 %v207_v17, %v205_v18 }
  0xac   : > { %211 = vrot.lane.b32.xlu2 %v209_v20, %s499_s17 }
  0xad   : > { %v142_v21 = vpop.permute.xlu1 %141  ;;  %v140_v23 = vpop.permute.xlu0 %139 }
  0xae   : > { %v146_v25 = vsel %vm145_vm0, %v140_v23, %v142_v21  ;;  %v147_v26 = vsel %vm145_vm0, %v142_v21, %v140_v23 }
  0xb5   : > { %v162_v27 = vpop.permute.xlu1 %161  ;;  %v151_v28 = vpop.permute.xlu0 %150 }
  0xb6   : > { %v153_v29 = vsel %vm152_vm1, %v149_v24, %v151_v28  ;;  %v154_v30 = vsel %vm152_vm1, %v151_v28, %v149_v24  ;;  %v166_v36 = vsel %vm165_vm2, %v162_v27, %v164_v33  ;;  %v167_v37 = vsel %vm165_vm2, %v164_v33, %v162_v27 }
  0xb7   : > { %v155_v31 = vadd.f32 %v153_v29, %v147_v26  ;;  %v156_v32 = vadd.f32 %v154_v30, %v146_v25 }
  0xb9   : > { %v157_v34 = vmul.f32 0.106450774, %v155_v31  ;;  %v158_v35 = vmul.f32 0.106450774, %v156_v32 }
  0xbb   : > { %v159_v42 = vadd.f32 %v157_v34, %v609_v4  ;;  %v160_v43 = vadd.f32 %v158_v35, %v606_v2 }
  0xbd   : > { %v171_v38 = vpop.permute.xlu1 %170  ;;  %v169_v39 = vpop.permute.xlu0 %168 }
  0xbe   : > { %v173_v40 = vsel %vm172_vm3, %v169_v39, %v171_v38  ;;  %v174_v41 = vsel %vm172_vm3, %v171_v38, %v169_v39 }
  0xbf   : > { %v175_v44 = vadd.f32 %v173_v40, %v167_v37  ;;  %v176_v45 = vadd.f32 %v174_v41, %v166_v36 }
  0xc1   : > { %v177_v46 = vmul.f32 0.00026386508, %v175_v44  ;;  %v178_v47 = vmul.f32 0.00026386508, %v176_v45 }
  0xc3   : > { %v179_v48 = vadd.f32 %v177_v46, %v159_v42  ;;  %v180_v49 = vadd.f32 %v178_v47, %v160_v43 }
  0xc5   : > { %181 = vst [vmem:[%s134_s27] sm:$0xff] %v179_v48  ;;  %v192_v52 = vpop.permute.xlu0 %191 }
  0xc6   : > { %182 = vst [vmem:[%s134_s27 + $0x8] sm:$0xff] %v180_v49  ;;  %v194_v53 = vadd.f32 %v192_v52, %v188_v51 }
  0xc8   : > { %196 = vst.msk [vmem:[%s134_s27] sm:$0xff] %vm195_vm4, %v194_v53 }
 0x106   : > { %v212_v54 = vpop.permute.xlu2 %211 }
 0x107   : > { %215 = vst.msk [vmem:[%s134_s27] sm:$0xff] %vm214_vm5, %v212_v54 }
 0x114   : > { %v240_v56 = vpop.permute.xlu0 %239 }
 0x116   : > { %v234_v55 = vpop.permute.xlu1 %233 }
 0x117   : > { %237 = vst.msk [vmem:[%s134_s27 + $0x8] sm:$0xff] %vm236_vm6, %v234_v55 }
 0x118   : > { %243 = vst.msk [vmem:[%s134_s27 + $0x8] sm:$0xff] %vm242_vm7, %v240_v56 }
 0x119   : > { %455 = shalt.err (!%p452_p4)
}
 0x11a   : > { %349 = dma.vmem_to_hbm [thread:$0]  (%p560_p10), %s259_s3, 256, %s261_s4, %s245_s5  }
 0x11b PF: > { %p360_p5 = scmp.ge.s32.totalorder %s494_s9, 2  ;;  %s272_s16 = sand.u32 1, %s482_s6  }
 0x11c   : > { %s273_s23 = scalar_lea.sflag [#allocation4], %s272_s16 }
 0x11d   : > { %p356_p7 = pnand %p360_p5, %p564_p11 }
 0x11f   : > { %p357_p8 = pneg %p356_p7 }
 0x121   : > { %477 = dma.done.wait (%p357_p8), %s273_s23, 256  }
 0x122   : > { %479 = vsyncadd (%p357_p8), %s273_s23, 4294967040  ;;  %p14_p9 = scmp.ge.s32.totalorder %s536_s12, 6   ;;  %s656_s6 = smov %s486_s7 }
 0x123   : > { %s657_s7 = smov %s490_s8  ;;  %s658_s8 = smov %s548_s15 }
 0x124   : > { %s659_s9 = smov %s536_s12  ;;  %16 = sbr.rel (!%p14_p9) target bundleno = 5 (0x5), region = 69 }
 0x129   :  { %279 = vsyncpa [#allocation3], 1 }
 0x12a   :  { %281 = vsyncpa [#allocation3 + $0x1], 1 }
 0x12b   :  { %282 = vsyncpa [#allocation4], 1 }
 0x12c   :  { %284 = vsyncpa [#allocation4 + $0x1], 1 }

</bundles_post_ra>
